<compile_context>
chip_gen: v7x
topology: tpu7x:2x2x1
jax: 0.10.0
libtpu: 0.0.40
codegen_flags: <defaults>
</compile_context>

<pallas_src>
import jax
import jax.numpy as jnp
from jax.experimental import pallas as pl
from jax.experimental.pallas import tpu as pltpu

_SUBLANE = 8
_MAX_TILE_T = 2048     # rows per grid step (f32 footprint well under VMEM limits)
_MIN_GRID_STEPS = 4    # keep >= 4 steps so v7x's 2 TensorCores both get work


def _round_up(n, m):
    return ((n + m - 1) // m) * m


def _g_ss_kernel(x_ref, ct_ref, o_ref):
    # x_ref: (tile_t, n_x), ct_ref: (n_x, n_y), o_ref: (tile_t, n_y)
    # C^T is pre-materialized in the wrapper, so this is a single MXU push.
    o_ref[...] = jnp.dot(
        x_ref[...], ct_ref[...], preferred_element_type=jnp.float32
    ).astype(o_ref.dtype)


def prepare_g_ss_params(C):
    """Once-per-parameter-update prep: materialize C^T (n_x, n_y)."""
    return jnp.asarray(C, jnp.float32).T


def g_ss_forward(x, ct, *, min_pallas_t=64):
    """Pallas equivalent of g_ss_class.forward.

    x  : (T, n_x) or (n_x,) float32
    ct : (n_x, n_y) float32  -- C^T from prepare_g_ss_params
    returns (T, n_y) or (n_y,) float32
    """
    x = jnp.asarray(x, jnp.float32)
    squeeze = x.ndim == 1
    if squeeze:
        x = x[None, :]

    T, n_x = x.shape
    n_x_c, n_y = ct.shape
    assert n_x == n_x_c, "feature dim mismatch"

    # Tiny-T / single-step path: pallas_call launch + DMA overhead dominates;
    # let XLA fuse the matmul directly.
    if T < min_pallas_t:
        y = jnp.dot(x, ct, preferred_element_type=jnp.float32)
        return y[0] if squeeze else y

    # Row tile: large (amortize ~0.35us per-step overhead) but with enough
    # grid steps that v7x can shard across its 2 TensorCores.  Multiple of
    # the 8-row sublane count; ragged last block handled by Pallas (output
    # rows are independent, so out-of-bounds garbage never pollutes results).
    tile_t = min(_MAX_TILE_T, _round_up(pl.cdiv(T, _MIN_GRID_STEPS), _SUBLANE))
    tile_t = max(tile_t, _SUBLANE)
    grid = (pl.cdiv(T, tile_t),)

    cost = pl.CostEstimate(
        flops=2 * T * n_x * n_y,
        transcendentals=0,
        bytes_accessed=4 * (T * n_x + T * n_y + n_x * n_y),
    )

    y = pl.pallas_call(
        _g_ss_kernel,
        out_shape=jax.ShapeDtypeStruct((T, n_y), jnp.float32),
        grid=grid,
        in_specs=[
            # Unpadded x: last dim == full array dim (legal even though < 128).
            pl.BlockSpec((tile_t, n_x), lambda i: (i, 0)),
            # C^T resident across the grid (constant index_map => no re-DMA).
            pl.BlockSpec((n_x, n_y), lambda i: (0, 0)),
        ],
        out_specs=pl.BlockSpec((tile_t, n_y), lambda i: (i, 0)),
        compiler_params=pltpu.CompilerParams(
            dimension_semantics=("parallel",),
        ),
        cost_estimate=cost,
    )(x, ct)

    return y[0] if squeeze else y


def make_C(n_y, n_x):
    """Deterministic parameter init matching the PyTorch __init__."""
    return jnp.zeros((n_y, n_x), dtype=jnp.float32).at[0, 0].set(1.0)


if __name__ == "__main__":
    n_x, n_y = 32, 16
    key = jax.random.PRNGKey(0)
    k1, k2, k3 = jax.random.split(key, 3)

    # Test with both the module's deterministic init and a random (trained-like)
    # C so the matmul is exercised non-trivially.
    C_init = make_C(n_y, n_x)
    C_rand = jax.random.normal(k1, (n_y, n_x), dtype=jnp.float32)

    for name, C in (("init", C_init), ("random", C_rand)):
        ct = prepare_g_ss_params(C)  # hoisted: once per parameter value

        # --- Single-step (n_x,) path ---
        x1 = jax.random.normal(k2, (n_x,), dtype=jnp.float32)
        y1 = jax.block_until_ready(g_ss_forward(x1, ct))
        assert y1.shape == (n_y,)
        assert jnp.allclose(y1, C @ x1, atol=1e-5), f"single-step mismatch ({name})"

        # --- Small-T fallback path ---
        xs = jax.random.normal(k3, (8, n_x), dtype=jnp.float32)
        ys = jax.block_until_ready(g_ss_forward(xs, ct))
        assert ys.shape == (8, n_y)
        assert jnp.allclose(ys, xs @ C.T, atol=1e-5), f"small-T mismatch ({name})"

        # --- Pallas path: divisible T (4 grid steps of 64 rows) ---
        T = 256
        xT = jax.random.normal(k3, (T, n_x), dtype=jnp.float32)
        yT = jax.block_until_ready(g_ss_forward(xT, ct))
        assert yT.shape == (T, n_y)
        assert jnp.allclose(yT, xT @ C.T, atol=1e-4), f"pallas path mismatch ({name})"

        # --- Pallas path: ragged T (last block extends past the array) ---
        Tr = 200
        xR = jax.random.normal(k2, (Tr, n_x), dtype=jnp.float32)
        yR = jax.block_until_ready(g_ss_forward(xR, ct))
        assert yR.shape == (Tr, n_y)
        assert jnp.allclose(yR, xR @ C.T, atol=1e-4), f"ragged path mismatch ({name})"

    print("KERNEL_OK")
</pallas_src>

<mosaic_0001>
module attributes {stable_mosaic.version = 11 : i64} {
  func.func @_g_ss_kernel(%arg0: i32, %arg1: memref<64x32xf32, #tpu.memory_space<vmem>>, %arg2: memref<32x16xf32, #tpu.memory_space<vmem>>, %arg3: memref<64x16xf32, #tpu.memory_space<vmem>>) attributes {dimension_semantics = [#tpu.dimension_semantics<parallel>], iteration_bounds = array<i64: 4>, scalar_prefetch = 0 : i64, scratch_operands = 0 : i64, tpu.core_type = #tpu.core_type<tc>, window_params = [{transform_indices = @transform_0, window_bounds = array<i64: 64, 32>}, {pipeline_mode = #tpu.pipeline_mode<synchronous>, transform_indices = @transform_1, window_bounds = array<i64: 32, 16>}, {transform_indices = @transform_2, window_bounds = array<i64: 64, 16>}]} {
    %c0 = arith.constant 0 : index
    %c0_0 = arith.constant 0 : index
    %0 = vector.load %arg1[%c0, %c0_0] : memref<64x32xf32, #tpu.memory_space<vmem>>, vector<64x32xf32>
    %c0_1 = arith.constant 0 : index
    %c0_2 = arith.constant 0 : index
    %1 = vector.load %arg2[%c0_1, %c0_2] : memref<32x16xf32, #tpu.memory_space<vmem>>, vector<32x16xf32>
    %cst = arith.constant dense<0.000000e+00> : vector<64x16xf32>
    %2 = tpu.matmul %0, %1, %cst {dimension_numbers = #tpu.dot_dimension_numbers<[1], [0], [0], [1], [0, 0, 1, 1], [], []>} : vector<64x32xf32>, vector<32x16xf32>, vector<64x16xf32> -> vector<64x16xf32>
    %c0_3 = arith.constant 0 : index
    %c0_4 = arith.constant 0 : index
    %3 = vector.load %arg3[%c0_3, %c0_4] : memref<64x16xf32, #tpu.memory_space<vmem>>, vector<64x16xf32>
    tpu.vector_store %arg3[%c0_3, %c0_4], %2 {strides = array<i32>} : memref<64x16xf32, #tpu.memory_space<vmem>>, vector<64x16xf32>,
    return
  }
  func.func @transform_0(%arg0: i32) -> (i32, i32) {
    %c0_i32 = arith.constant 0 : i32
    %c0_i32_0 = arith.constant 0 : i32
    return %arg0, %c0_i32 : i32, i32
  }
  func.func @transform_1(%arg0: i32) -> (i32, i32) {
    %c0_i32 = arith.constant 0 : i32
    %c0_i32_0 = arith.constant 0 : i32
    %c0_i32_1 = arith.constant 0 : i32
    return %c0_i32, %c0_i32_0 : i32, i32
  }
  func.func @transform_2(%arg0: i32) -> (i32, i32) {
    %c0_i32 = arith.constant 0 : i32
    %c0_i32_0 = arith.constant 0 : i32
    return %arg0, %c0_i32 : i32, i32
  }
}

</mosaic_0001>

<bundles_post_ra>
// kernel: tpu_custom_call.1
= control target key start
LH: loop header
LB: loop body
LE: loop exit
PB: predicated region body
PF: predicated region fallthrough
CT: control target
= control target key end

     0   :  { %s448_s9 = smov 0   ;;  %s493_s0 = inlined_call_operand.vmem [shape: f32[256,32], index: 0, kind: input, shape index: {}]   ;;  %s494_s1 = inlined_call_operand.vmem [shape: f32[32,16], index: 1, kind: input, shape index: {}]   ;;  %s495_s2 = inlined_call_operand.vmem [shape: f32[256,16], index: 2, kind: output, shape index: {}]  }
   0x1 LB: > { %s354_s10 = sadd.s32 4294967295, %s431_s9   ;;  %p358_p0 = scmp.ge.s32.totalorder %s431_s9, 1  ;;  %s431_s9 = sphi %s448_s9, %s12_s9  }
   0x2   : > { %p113_p1 = scmp.lt.s32.totalorder %s431_s9, 5 }
   0x4   : > { %p114_p2 = pnand %p358_p0, %p113_p1 }
   0x5   : > { %v155_v0 = vld [vmem:[%s494_s1] sm:$0xff] (!%p114_p2)  ;;  %v156_v1 = vld [vmem:[%s494_s1 + $0x8] sm:$0xff] (!%p114_p2)  ;;  %v157_v2 = vld [vmem:[%s494_s1 + $0x10] sm:$0xff] (!%p114_p2)  ;;  %s359_s17 = sshll.u32 (!%p114_p2), %s354_s10, 3  ;;  %vm159_vm0 = vcmask (!%p114_p2), 261120   ;;  %vm289_vm1 = vcmask (!%p114_p2), 130048  }
   0x6   : > { %117 = sbr.rel (%p114_p2) target bundleno = 237 (0xed), region = 28  ;;  %v405_v3 = vpack.c.bf16 (!%p114_p2), %v156_v1, %v155_v0  ;;  %v158_v4 = vld [vmem:[%s494_s1 + $0x18] sm:$0xff] (!%p114_p2)  ;;  %p136_p3 = scmp.lt.s32.totalorder (!%p114_p2), %s359_s17, 31 }
   0x7   : > { %v409_v5 = vpack.c.bf16 (!%p114_p2), %v158_v4, %v157_v2 }
   0x8   : > { %406 = vmatprep.subr.bf16.mxu0 (!%p114_p2), %v405_v3  ;;  %413 = vmatprep.subr.bf16.mxu1 (!%p114_p2), %v405_v3 }
   0x9   : > { %408 = vmatpush3.bf16.msra.mxu0 (!%p114_p2), %v405_v3  ;;  %415 = vmatpush3.bf16.msra.mxu1 (!%p114_p2), %v405_v3 }
   0xa   : > { %410 = vmatprep.subr.bf16.mxu0 (!%p114_p2), %v409_v5  ;;  %414 = vmatprep.subr.bf16.mxu1 (!%p114_p2), %v409_v5 }
   0xd   : > { %s497_s17 = smov (!%p136_p3, %s359_s17), 31  ;;  %412 = vmatpush3.bf16.msra.mxu0 %v409_v5  ;;  %416 = vmatpush3.bf16.msra.mxu1 %v409_v5 }
   0xe   : > { %s360_s20 = sshll.u32 %s497_s17, 3 }
   0xf   : > { %s139_s23 = scalar_lea.vmem %s493_s0, %s360_s20  ;;  %s145_s26 = scalar_lea.vmem %s495_s2, %s360_s20 }
  0x10   : > { %v147_v6 = vld [vmem:[%s139_s23] sm:$0xff]  ;;  %v148_v8 = vld [vmem:[%s139_s23 + $0x8] sm:$0xff]  ;;  %v149_v10 = vld [vmem:[%s139_s23 + $0x10] sm:$0xff] }
  0x11   : > { %v151_v7 = vld [vmem:[%s139_s23 + $0x20] sm:$0xff]  ;;  %v152_v9 = vld [vmem:[%s139_s23 + $0x28] sm:$0xff]  ;;  %393 = vmatprep.mubr.msk.f32.mxu0 %vm159_vm0, %v147_v6  ;;  %v153_v11 = vld [vmem:[%s139_s23 + $0x30] sm:$0xff] }
  0x12   : > { %399 = vmatprep.mubr.msk.f32.mxu1 %vm159_vm0, %v151_v7  ;;  %394 = vmatmul.mubr.msk.f32.vlgmr.msra.gmra.mrb[0].mxu0 %vm159_vm0, %v148_v8  ;;  %v150_v12 = vld [vmem:[%s139_s23 + $0x18] sm:$0xff] }
  0x13   : > { %400 = vmatmul.mubr.msk.f32.vlgmr.msra.gmra.mrb[0].mxu1 %vm159_vm0, %v152_v9  ;;  %396 = vmatprep.mubr.msk.f32.mxu0 %vm159_vm0, %v149_v10  ;;  %v154_v13 = vld [vmem:[%s139_s23 + $0x38] sm:$0xff] }
  0x14   : > { %402 = vmatprep.mubr.msk.f32.mxu1 %vm159_vm0, %v153_v11 }
  0x16   : > { %397 = vmatmul.mubr.msk.f32.gmra.mrb[2].mxu0 %vm159_vm0, %v150_v12 }
  0x17   : > { %403 = vmatmul.mubr.msk.f32.gmra.mrb[2].mxu1 %vm159_vm0, %v154_v13 }
  0xe5   : > { %v395_v14 = vpop.f32.mrb[0].mxu0 }
  0xe6   : > { %v401_v15 = vpop.f32.mrb[0].mxu1  ;;  %291 = vst.msk [vmem:[%s145_s26 + $0x8] sm:$0xff] %vm289_vm1, %v395_v14  ;;  %v250_v16 = vpop.f32.mrb[1].mxu0 }
  0xe7   : > { %295 = vst.msk [vmem:[%s145_s26 + $0x28] sm:$0xff] %vm289_vm1, %v401_v15  ;;  %v270_v17 = vpop.f32.mrb[1].mxu1  ;;  %290 = vst.msk [vmem:[%s145_s26] sm:$0xff] %vm289_vm1, %v250_v16 }
  0xe8   : > { %294 = vst.msk [vmem:[%s145_s26 + $0x20] sm:$0xff] %vm289_vm1, %v270_v17 }
  0xe9   : > { %v398_v18 = vpop.f32.mrb[2].mxu0 }
  0xea   : > { %v404_v19 = vpop.f32.mrb[2].mxu1  ;;  %293 = vst.msk [vmem:[%s145_s26 + $0x18] sm:$0xff] %vm289_vm1, %v398_v18  ;;  %v260_v20 = vpop.f32.mrb[3].mxu0 }
  0xeb   : > { %297 = vst.msk [vmem:[%s145_s26 + $0x38] sm:$0xff] %vm289_vm1, %v404_v19  ;;  %v280_v21 = vpop.f32.mrb[3].mxu1  ;;  %292 = vst.msk [vmem:[%s145_s26 + $0x10] sm:$0xff] %vm289_vm1, %v260_v20 }
  0xec   : > { %296 = vst.msk [vmem:[%s145_s26 + $0x30] sm:$0xff] %vm289_vm1, %v280_v21 }
  0xed PF: > { %s12_s9 = sadd.s32 1, %s431_s9  }
  0xee   : > { %p9_p4 = scmp.ge.s32.totalorder %s12_s9, 6  }
  0xf0   :  { %11 = sbr.rel (!%p9_p4) target bundleno = 1 (0x1), region = 58 }

</bundles_post_ra>
